<compile_context>
chip_gen: v6e
topology: v6e:2x2x1
jax: 0.10.0
libtpu: 0.0.40
codegen_flags: <defaults>
</compile_context>

<pallas_src>
import functools

import numpy as np
import jax
import jax.numpy as jnp
from jax import lax
from jax.experimental import pallas as pl
from jax.experimental.pallas import tpu as pltpu

_MiB = 1024 * 1024


def _round_up(x, m):
    return ((x + m - 1) // m) * m


def _physical_vmem_bytes():
    """Per-core VMEM capacity of the local TPU generation (guarded query)."""
    try:
        info = pltpu.get_tpu_info()
        cap = int(getattr(info, "vmem_capacity_bytes", 0) or 0)
        if cap > 0:
            return cap
    except Exception:
        pass
    return 64 * _MiB  # conservative default: v7x per-TensorCore VMEM


def _choose_tiles(B, D, C, max_tb):
    """Pick batch tile TB, grid size G and the vmem limit from the HW generation's budget."""
    phys = _physical_vmem_bytes()
    # Scoped-VMEM target with headroom: ~48 MiB on v7x (64 MiB phys), ~96 MiB on v5e/v6e.
    budget = max(16 * _MiB, min(phys * 3 // 4, phys - 16 * _MiB))

    resident = 2 * (D * C * 2 + C * 4)            # weight + bias (worst case double-buffered)
    stream_per_row = 2 * (2 * D + C)              # double-buffered bf16 x + int8 target code
    temp_per_row = 6 * C * 4                      # f32 elementwise temporaries in the body
    avail = budget - resident - 2 * _MiB
    fit = max(32, avail // max(stream_per_row + temp_per_row, 1))
    tb_cap = int(min(max_tb, (fit // 32) * 32))   # multiple of 32 covers int8 sublane tiling

    if B < 64:
        # One full-dim tile: block dims equal to the array dims are always legal (any dtype).
        TB, G = B, 1
    else:
        g = max(2, pl.cdiv(B, tb_cap))            # >= 2 balanced tiles -> both TCs on v7x
        TB = int(min(tb_cap, _round_up(pl.cdiv(B, g), 32)))
        G = pl.cdiv(B, TB)

    est = (resident + TB * stream_per_row + TB * temp_per_row + 2 * C * 4)
    vmem_limit = int(min(budget, max(8 * _MiB, 4 * est)))
    return TB, G, vmem_limit


def attr_classifier_kernel(x_ref, w_ref, b_ref, code_ref, out_ref, *,
                           inv_bc, tb, total_rows, needs_row_mask):
    """Fused Linear + masked multilabel soft-margin loss for one batch tile.

    x_ref    : [TB, D]  bf16  feature tile
    w_ref    : [D,  C]  bf16  resident classifier weight (nn.Linear weight, transposed)
    b_ref    : [1,  C]  f32   resident bias
    code_ref : [TB, C]  int8  packed targets: m * (1 + 2*y) in {0, 1, 3}
    out_ref  : [1,1,C]  f32   per-tile partial loss row (already scaled by 1/(B*C))
    """
    # MXU: bf16 x bf16 -> f32 accumulation
    scores = jnp.dot(x_ref[...], w_ref[...],
                     preferred_element_type=jnp.float32) + b_ref[...]        # [TB, C] f32

    code = code_ref[...].astype(jnp.float32)   # int8 {0,1,3} -> f32; cheap VPU op under DMA

    # Fused soft-margin: -(y*logsig(s) + (1-y)*logsig(-s)) == softplus(s) - y*s
    # stable softplus(s) = max(s, 0) + log1p(exp(-|s|))
    sp = jnp.maximum(scores, 0.0) + jnp.log1p(jnp.exp(-jnp.abs(scores)))
    elem = sp - jnp.where(code > 1.5, scores, 0.0)   # subtract y*s only where y == 1
    elem = jnp.where(code > 0.5, elem, 0.0)          # apply the loss mask m

    if needs_row_mask:
        # Ragged last tile: rows past the real batch size hold undefined data -> zero them.
        row = lax.broadcasted_iota(jnp.int32, (tb, 1), 0)
        valid = (pl.program_id(0) * tb + row) < total_rows
        elem = jnp.where(valid, elem, 0.0)

    out_ref[0] = jnp.sum(elem, axis=0, keepdims=True) * inv_bc               # lane-dense [1, C]


def _build_call(kernel, G, TB, D, C, vmem_limit, single_buffer_resident):
    if single_buffer_resident and hasattr(pl, "Buffered"):
        # Resident operands: constant index_map + single buffer (halves their VMEM footprint).
        w_spec = pl.BlockSpec((D, C), lambda i: (0, 0), pipeline_mode=pl.Buffered(1))
        b_spec = pl.BlockSpec((1, C), lambda i: (0, 0), pipeline_mode=pl.Buffered(1))
    else:
        w_spec = pl.BlockSpec((D, C), lambda i: (0, 0))
        b_spec = pl.BlockSpec((1, C), lambda i: (0, 0))

    return pl.pallas_call(
        kernel,
        out_shape=jax.ShapeDtypeStruct((G, 1, C), jnp.float32),
        grid_spec=pltpu.PrefetchScalarGridSpec(
            num_scalar_prefetch=0,
            grid=(G,),
            in_specs=[
                pl.BlockSpec((TB, D), lambda i: (i, 0)),   # features tile (pipelined)
                w_spec,                                    # weight: resident across grid
                b_spec,                                    # bias: resident
                pl.BlockSpec((TB, C), lambda i: (i, 0)),   # packed int8 targets tile
            ],
            out_specs=pl.BlockSpec((1, 1, C), lambda i: (i, 0, 0)),
        ),
        compiler_params=pltpu.CompilerParams(
            dimension_semantics=("parallel",),             # independent B-tiles -> megacore
            vmem_limit_bytes=vmem_limit,
        ),
    )


def pack_attr_targets(attributes_f, loss_mask):
    """Pack 0/1 attributes + 0/1 loss mask into one int8 code: m * (1 + 2*y) in {0, 1, 3}.

    Done once upstream (where the mask is built) so the kernel streams 1 byte/elem instead of
    8 bytes/elem of separate f32 y + f32 m.
    """
    return (loss_mask * (1.0 + 2.0 * attributes_f)).astype(jnp.int8)


def attr_classifier_forward(features, weight, bias, target_code, *, max_tb=1024):
    """features: [B, D] (cast to bf16), weight: [D, C], bias: [C] or [1, C],
    target_code: [B, C] int8 from pack_attr_targets.

    Returns  sum_{i,c} m * (softplus(s) - y*s) / (B*C)  -- same semantics as
    AttrClassifier + AttrSoftLoss forward.
    """
    B, D = features.shape
    C = weight.shape[1]

    # NOTE: at the deployed toy shape (B=2, C=16) this whole problem is less than one vreg of
    # work; in production prefer plain fused jnp (or batch many samples per call) -- the Pallas
    # kernel only pays off for B in the thousands.
    xf = features.astype(jnp.bfloat16)      # no-op if the caller already passes bf16
    wp = weight.astype(jnp.bfloat16)
    bp = bias.astype(jnp.float32).reshape(1, C)
    code = target_code.astype(jnp.int8)

    TB, G, vmem_limit = _choose_tiles(B, D, C, max_tb)

    kernel = functools.partial(
        attr_classifier_kernel,
        inv_bc=1.0 / float(B * C),          # static, hoisted out of the kernel epilogue
        tb=TB,
        total_rows=B,
        needs_row_mask=(G * TB != B),
    )

    def _run(single_buffer_resident):
        call = _build_call(kernel, G, TB, D, C, vmem_limit, single_buffer_resident)
        return jax.block_until_ready(call(xf, wp, bp, code))

    try:
        partials = _run(True)
    except Exception:
        # Fallback for jax builds where pipeline_mode=pl.Buffered(1) is not accepted.
        partials = _run(False)

    # Tiny final reduction over the per-tile partial rows.
    return jnp.sum(partials)


def build_loss_mask(attributes_np, drop_frac=0.95, seed=0):
    """Host-side replica of AttrSoftLoss mask construction."""
    # TODO(synk): per-sample variable-size np.random.choice without replacement has no clean
    # Pallas equivalent; the mask is generated deterministically on the host (glue code).
    rng = np.random.RandomState(seed)
    B, C = attributes_np.shape
    mask = np.ones((B, C), dtype=np.float32)
    for i in range(B):
        zeros = np.nonzero(attributes_np[i] == 0)[0]
        k = int(round(len(zeros) * drop_frac))
        if k > 0:
            idx = rng.choice(zeros, k, replace=False)
            mask[i, idx] = 0.0
    return mask


def _reference_loss(features, weight, bias, attributes_f, loss_mask):
    """Pure-JAX f32 reference of the masked MultiLabelSoftMarginLoss."""
    s = features @ weight + bias.reshape(1, -1)
    logsig = lambda z: jnp.minimum(z, 0.0) - jnp.log1p(jnp.exp(-jnp.abs(z)))
    per = -(attributes_f * logsig(s) + (1.0 - attributes_f) * logsig(-s)) * loss_mask
    B, C = attributes_f.shape
    return jnp.sum(per) / (B * C)


if __name__ == "__main__":
    # Shapes implied by AttrClassifier.__init__:
    #   in_dim = feat_dim * crop_height * crop_width = 4 * 4 * 4 = 64
    #   num_class = num_attr = 16, batch = 2
    B, feat_dim, crop_h, crop_w, num_attr = 2, 4, 4, 4, 16
    in_dim = feat_dim * crop_h * crop_w

    key = jax.random.PRNGKey(0)
    k_feat, k_w, k_b, k_attr = jax.random.split(key, 4)

    # agg_data['features'] already flattened to [B, in_dim]
    features = jax.random.normal(k_feat, (B, in_dim), dtype=jnp.float32)
    attributes = (jax.random.uniform(k_attr, (B, num_attr)) < 0.3).astype(jnp.float32)

    # nn.Linear-style init (weight stored transposed: [in_dim, num_class])
    bound = 1.0 / np.sqrt(in_dim)
    weight = jax.random.uniform(k_w, (in_dim, num_attr),
                                minval=-bound, maxval=bound, dtype=jnp.float32)
    bias = jax.random.uniform(k_b, (1, num_attr),
                              minval=-bound, maxval=bound, dtype=jnp.float32)

    # AttrSoftLoss's random 95% drop of zero-attribute indices (host-side, deterministic)
    loss_mask = jnp.asarray(build_loss_mask(np.asarray(attributes)), dtype=jnp.float32)

    # Upstream, one-time packing + casts (in a real pipeline this happens where the mask is built).
    code = pack_attr_targets(attributes, loss_mask)
    features_bf16 = features.astype(jnp.bfloat16)

    loss = attr_classifier_forward(features_bf16, weight, bias, code)
    loss = jax.block_until_ready(loss)

    ref = jax.block_until_ready(
        _reference_loss(features, weight, bias, attributes, loss_mask))

    assert np.isfinite(float(loss)), "loss is not finite"
    assert np.allclose(float(loss), float(ref), rtol=5e-2, atol=5e-3), \
        f"kernel loss {float(loss)} != reference {float(ref)}"
    print("KERNEL_OK")
</pallas_src>

<mosaic_0001>
module attributes {stable_mosaic.version = 11 : i64} {
  func.func @attr_classifier_kernel(%arg0: i32, %arg1: memref<2x64xbf16, #tpu.memory_space<vmem>>, %arg2: memref<64x16xbf16, #tpu.memory_space<vmem>>, %arg3: memref<1x16xf32, #tpu.memory_space<vmem>>, %arg4: memref<2x16xi8, #tpu.memory_space<vmem>>, %arg5: memref<1x1x16xf32, #tpu.memory_space<vmem>>) attributes {dimension_semantics = [#tpu.dimension_semantics<parallel>], iteration_bounds = array<i64: 1>, scalar_prefetch = 0 : i64, scratch_operands = 0 : i64, tpu.core_type = #tpu.core_type<tc>, window_params = [{transform_indices = @transform_0, window_bounds = array<i64: 2, 64>}, {pipeline_mode = #tpu.pipeline_mode<synchronous>, transform_indices = @transform_1, window_bounds = array<i64: 64, 16>}, {pipeline_mode = #tpu.pipeline_mode<synchronous>, transform_indices = @transform_2, window_bounds = array<i64: 1, 16>}, {transform_indices = @transform_3, window_bounds = array<i64: 2, 16>}, {transform_indices = @transform_4, window_bounds = array<i64: 1, 1, 16>}]} {
    %c0 = arith.constant 0 : index
    %c0_0 = arith.constant 0 : index
    %0 = vector.load %arg1[%c0, %c0_0] : memref<2x64xbf16, #tpu.memory_space<vmem>>, vector<2x64xbf16>
    %c0_1 = arith.constant 0 : index
    %c0_2 = arith.constant 0 : index
    %1 = vector.load %arg2[%c0_1, %c0_2] : memref<64x16xbf16, #tpu.memory_space<vmem>>, vector<64x16xbf16>
    %cst = arith.constant dense<0.000000e+00> : vector<2x16xf32>
    %2 = tpu.matmul %0, %1, %cst {dimension_numbers = #tpu.dot_dimension_numbers<[1], [0], [0], [1], [0, 0, 1, 1], [], []>} : vector<2x64xbf16>, vector<64x16xbf16>, vector<2x16xf32> -> vector<2x16xf32>
    %c0_3 = arith.constant 0 : index
    %c0_4 = arith.constant 0 : index
    %3 = vector.load %arg3[%c0_3, %c0_4] : memref<1x16xf32, #tpu.memory_space<vmem>>, vector<1x16xf32>
    %4 = vector.broadcast %3 : vector<1x16xf32> to vector<2x16xf32>
    %5 = arith.addf %2, %4 : vector<2x16xf32>
    %c0_5 = arith.constant 0 : index
    %c0_6 = arith.constant 0 : index
    %6 = vector.load %arg4[%c0_5, %c0_6] : memref<2x16xi8, #tpu.memory_space<vmem>>, vector<2x16xi8>
    %7 = arith.sitofp %6 : vector<2x16xi8> to vector<2x16xf32>
    %cst_7 = arith.constant 0.000000e+00 : f32
    %8 = vector.broadcast %cst_7 : f32 to vector<2x16xf32>
    %9 = arith.maximumf %5, %8 : vector<2x16xf32>
    %10 = math.absf %5 : vector<2x16xf32>
    %cst_8 = arith.constant 0.000000e+00 : f32
    %11 = vector.broadcast %cst_8 : f32 to vector<2x16xf32>
    %12 = arith.subf %11, %10 : vector<2x16xf32>
    %13 = math.exp %12 : vector<2x16xf32>
    %14 = math.log1p %13 : vector<2x16xf32>
    %15 = arith.addf %9, %14 : vector<2x16xf32>
    %cst_9 = arith.constant 1.500000e+00 : f32
    %16 = vector.broadcast %cst_9 : f32 to vector<2x16xf32>
    %17 = arith.cmpf ogt, %7, %16 : vector<2x16xf32>
    %cst_10 = arith.constant 0.000000e+00 : f32
    %18 = vector.broadcast %cst_10 : f32 to vector<2x16xf32>
    %19 = arith.select %17, %5, %18 : vector<2x16xi1>, vector<2x16xf32>
    %20 = arith.subf %15, %19 : vector<2x16xf32>
    %cst_11 = arith.constant 5.000000e-01 : f32
    %21 = vector.broadcast %cst_11 : f32 to vector<2x16xf32>
    %22 = arith.cmpf ogt, %7, %21 : vector<2x16xf32>
    %cst_12 = arith.constant 0.000000e+00 : f32
    %23 = vector.broadcast %cst_12 : f32 to vector<2x16xf32>
    %24 = arith.select %22, %20, %23 : vector<2x16xi1>, vector<2x16xf32>
    %cst_13 = arith.constant dense<0.000000e+00> : vector<16xf32>
    %25 = vector.multi_reduction <add>, %24, %cst_13 [0] : vector<2x16xf32> to vector<16xf32>
    %26 = vector.shape_cast %25 : vector<16xf32> to vector<1x16xf32>
    %cst_14 = arith.constant 3.125000e-02 : f32
    %27 = vector.broadcast %cst_14 : f32 to vector<1x16xf32>
    %28 = arith.mulf %26, %27 : vector<1x16xf32>
    %c0_15 = arith.constant 0 : index
    %c0_16 = arith.constant 0 : index
    %c0_17 = arith.constant 0 : index
    %29 = vector.load %arg5[%c0_15, %c0_16, %c0_17] : memref<1x1x16xf32, #tpu.memory_space<vmem>>, vector<1x1x16xf32>
    %30 = vector.shape_cast %29 : vector<1x1x16xf32> to vector<1x16xf32>
    %31 = vector.shape_cast %28 : vector<1x16xf32> to vector<1x1x16xf32>
    tpu.vector_store %arg5[%c0_15, %c0_16, %c0_17], %31 {strides = array<i32>} : memref<1x1x16xf32, #tpu.memory_space<vmem>>, vector<1x1x16xf32>,
    return
  }
  func.func @transform_0(%arg0: i32) -> (i32, i32) {
    %c0_i32 = arith.constant 0 : i32
    %c0_i32_0 = arith.constant 0 : i32
    return %arg0, %c0_i32 : i32, i32
  }
  func.func @transform_1(%arg0: i32) -> (i32, i32) {
    %c0_i32 = arith.constant 0 : i32
    %c0_i32_0 = arith.constant 0 : i32
    %c0_i32_1 = arith.constant 0 : i32
    return %c0_i32, %c0_i32_0 : i32, i32
  }
  func.func @transform_2(%arg0: i32) -> (i32, i32) {
    %c0_i32 = arith.constant 0 : i32
    %c0_i32_0 = arith.constant 0 : i32
    %c0_i32_1 = arith.constant 0 : i32
    return %c0_i32, %c0_i32_0 : i32, i32
  }
  func.func @transform_3(%arg0: i32) -> (i32, i32) {
    %c0_i32 = arith.constant 0 : i32
    %c0_i32_0 = arith.constant 0 : i32
    return %arg0, %c0_i32 : i32, i32
  }
  func.func @transform_4(%arg0: i32) -> (i32, i32, i32) {
    %c0_i32 = arith.constant 0 : i32
    %c0_i32_0 = arith.constant 0 : i32
    %c0_i32_1 = arith.constant 0 : i32
    return %arg0, %c0_i32, %c0_i32_0 : i32, i32, i32
  }
}

module attributes {stable_mosaic.version = 11 : i64} {
  func.func @attr_classifier_kernel(%arg0: i32, %arg1: memref<2x64xbf16, #tpu.memory_space<vmem>>, %arg2: memref<64x16xbf16, #tpu.memory_space<vmem>>, %arg3: memref<1x16xf32, #tpu.memory_space<vmem>>, %arg4: memref<2x16xi8, #tpu.memory_space<vmem>>, %arg5: memref<1x1x16xf32, #tpu.memory_space<vmem>>) attributes {dimension_semantics = [#tpu.dimension_semantics<parallel>], iteration_bounds = array<i64: 1>, scalar_prefetch = 0 : i64, scratch_operands = 0 : i64, tpu.core_type = #tpu.core_type<tc>, window_params = [{transform_indices = @transform_0, window_bounds = array<i64: 2, 64>}, {pipeline_mode = #tpu.pipeline_mode<synchronous>, transform_indices = @transform_1, window_bounds = array<i64: 64, 16>}, {pipeline_mode = #tpu.pipeline_mode<synchronous>, transform_indices = @transform_2, window_bounds = array<i64: 1, 16>}, {transform_indices = @transform_3, window_bounds = array<i64: 2, 16>}, {transform_indices = @transform_4, window_bounds = array<i64: 1, 1, 16>}]} {
    %c0 = arith.constant 0 : index
    %c0_0 = arith.constant 0 : index
    %0 = vector.load %arg1[%c0, %c0_0] : memref<2x64xbf16, #tpu.memory_space<vmem>>, vector<2x64xbf16>
    %c0_1 = arith.constant 0 : index
    %c0_2 = arith.constant 0 : index
    %1 = vector.load %arg2[%c0_1, %c0_2] : memref<64x16xbf16, #tpu.memory_space<vmem>>, vector<64x16xbf16>
    %cst = arith.constant dense<0.000000e+00> : vector<2x16xf32>
    %2 = tpu.matmul %0, %1, %cst {dimension_numbers = #tpu.dot_dimension_numbers<[1], [0], [0], [1], [0, 0, 1, 1], [], []>} : vector<2x64xbf16>, vector<64x16xbf16>, vector<2x16xf32> -> vector<2x16xf32>
    %c0_3 = arith.constant 0 : index
    %c0_4 = arith.constant 0 : index
    %3 = vector.load %arg3[%c0_3, %c0_4] : memref<1x16xf32, #tpu.memory_space<vmem>>, vector<1x16xf32>
    %4 = vector.broadcast %3 : vector<1x16xf32> to vector<2x16xf32>
    %5 = arith.addf %2, %4 : vector<2x16xf32>
    %c0_5 = arith.constant 0 : index
    %c0_6 = arith.constant 0 : index
    %6 = vector.load %arg4[%c0_5, %c0_6] : memref<2x16xi8, #tpu.memory_space<vmem>>, vector<2x16xi8>
    %7 = arith.sitofp %6 : vector<2x16xi8> to vector<2x16xf32>
    %cst_7 = arith.constant 0.000000e+00 : f32
    %8 = vector.broadcast %cst_7 : f32 to vector<2x16xf32>
    %9 = arith.maximumf %5, %8 : vector<2x16xf32>
    %10 = math.absf %5 : vector<2x16xf32>
    %cst_8 = arith.constant 0.000000e+00 : f32
    %11 = vector.broadcast %cst_8 : f32 to vector<2x16xf32>
    %12 = arith.subf %11, %10 : vector<2x16xf32>
    %13 = math.exp %12 : vector<2x16xf32>
    %14 = math.log1p %13 : vector<2x16xf32>
    %15 = arith.addf %9, %14 : vector<2x16xf32>
    %cst_9 = arith.constant 1.500000e+00 : f32
    %16 = vector.broadcast %cst_9 : f32 to vector<2x16xf32>
    %17 = arith.cmpf ogt, %7, %16 : vector<2x16xf32>
    %cst_10 = arith.constant 0.000000e+00 : f32
    %18 = vector.broadcast %cst_10 : f32 to vector<2x16xf32>
    %19 = arith.select %17, %5, %18 : vector<2x16xi1>, vector<2x16xf32>
    %20 = arith.subf %15, %19 : vector<2x16xf32>
    %cst_11 = arith.constant 5.000000e-01 : f32
    %21 = vector.broadcast %cst_11 : f32 to vector<2x16xf32>
    %22 = arith.cmpf ogt, %7, %21 : vector<2x16xf32>
    %cst_12 = arith.constant 0.000000e+00 : f32
    %23 = vector.broadcast %cst_12 : f32 to vector<2x16xf32>
    %24 = arith.select %22, %20, %23 : vector<2x16xi1>, vector<2x16xf32>
    %cst_13 = arith.constant dense<0.000000e+00> : vector<16xf32>
    %25 = vector.multi_reduction <add>, %24, %cst_13 [0] : vector<2x16xf32> to vector<16xf32>
    %26 = vector.shape_cast %25 : vector<16xf32> to vector<1x16xf32>
    %cst_14 = arith.constant 3.125000e-02 : f32
    %27 = vector.broadcast %cst_14 : f32 to vector<1x16xf32>
    %28 = arith.mulf %26, %27 : vector<1x16xf32>
    %c0_15 = arith.constant 0 : index
    %c0_16 = arith.constant 0 : index
    %c0_17 = arith.constant 0 : index
    %29 = vector.load %arg5[%c0_15, %c0_16, %c0_17] : memref<1x1x16xf32, #tpu.memory_space<vmem>>, vector<1x1x16xf32>
    %30 = vector.shape_cast %29 : vector<1x1x16xf32> to vector<1x16xf32>
    %31 = vector.shape_cast %28 : vector<1x16xf32> to vector<1x1x16xf32>
    tpu.vector_store %arg5[%c0_15, %c0_16, %c0_17], %31 {strides = array<i32>} : memref<1x1x16xf32, #tpu.memory_space<vmem>>, vector<1x1x16xf32>,
    return
  }
  func.func @transform_0(%arg0: i32) -> (i32, i32) {
    %c0_i32 = arith.constant 0 : i32
    %c0_i32_0 = arith.constant 0 : i32
    return %arg0, %c0_i32 : i32, i32
  }
  func.func @transform_1(%arg0: i32) -> (i32, i32) {
    %c0_i32 = arith.constant 0 : i32
    %c0_i32_0 = arith.constant 0 : i32
    %c0_i32_1 = arith.constant 0 : i32
    return %c0_i32, %c0_i32_0 : i32, i32
  }
  func.func @transform_2(%arg0: i32) -> (i32, i32) {
    %c0_i32 = arith.constant 0 : i32
    %c0_i32_0 = arith.constant 0 : i32
    %c0_i32_1 = arith.constant 0 : i32
    return %c0_i32, %c0_i32_0 : i32, i32
  }
  func.func @transform_3(%arg0: i32) -> (i32, i32) {
    %c0_i32 = arith.constant 0 : i32
    %c0_i32_0 = arith.constant 0 : i32
    return %arg0, %c0_i32 : i32, i32
  }
  func.func @transform_4(%arg0: i32) -> (i32, i32, i32) {
    %c0_i32 = arith.constant 0 : i32
    %c0_i32_0 = arith.constant 0 : i32
    %c0_i32_1 = arith.constant 0 : i32
    return %arg0, %c0_i32, %c0_i32_0 : i32, i32, i32
  }
}

</mosaic_0001>

<bundles_post_ra>
// kernel: tpu_custom_call.1
= control target key start
LH: loop header
LB: loop body
LE: loop exit
PB: predicated region body
PF: predicated region fallthrough
CT: control target
= control target key end

     0   :  { %v207_v1 = vmov 0.0   ;;  %vm208_vm0 = vmmov 0   ;;  %s259_s0 = inlined_call_operand.vmem [shape: bf16[2,64], index: 0, kind: input, shape index: {}]   ;;  %s260_s1 = inlined_call_operand.vmem [shape: bf16[64,16], index: 1, kind: input, shape index: {}]   ;;  %s261_s2 = inlined_call_operand.vmem [shape: f32[1,16], index: 2, kind: input, shape index: {}]   ;;  %s262_s3 = inlined_call_operand.vmem [shape: s8[2,16], index: 3, kind: input, shape index: {}]   ;;  %s263_s4 = inlined_call_operand.hbm [shape: f32[1,1,16], index: 4, kind: output, shape index: {}]  }
   0x1   :  { %v177_v0 = vld [vmem:[%s260_s1 + $0x18] sm:$0xff]   ;;  %162 = vmatprep.subr.bf16.mxu0 %v207_v1  ;;  %v178_v2 = vld [vmem:[%s260_s1 + $0x10] sm:$0xff]   ;;  %170 = vmatprep.mubr.msk.bf16.mxu0 %vm208_vm0, %v207_v1 }
   0x2   :  { %163 = vmatpush3.bf16.msra.mxu0 %v177_v0 }
   0x3   :  { %164 = vmatprep.subr.bf16.mxu0 %v207_v1 }
   0x4   :  { %9 = vsyncpa [#allocation3], 0  ;;  %v179_v3 = vld [vmem:[%s260_s1 + $0x8] sm:$0xff]   ;;  %v180_v4 = vld [vmem:[%s260_s1] sm:$0xff]   ;;  %vm59_vm1 = vcmask 523264   ;;  %vm126_vm5 = vcmask 123904  }
   0x5   :  { %v19_v5 = vld [vmem:[%s259_s0] sm:$0x1]  ;;  %vm135_vm6 = vcmask 122880  }
   0x6   :  { %165 = vmatpush3.bf16.msra.mxu0 %v178_v2  ;;  %v151_v6 = vld [vmem:[%s261_s2] ss:$0 sm:$0xff]  ;;  %s209_s2 = smov [#allocation2]  }
   0x7   :  { %166 = vmatprep.subr.bf16.mxu0 %v207_v1  ;;  %v103_v17 = vld [vmem:[%s262_s3] sm:$0x1]  ;;  %s143_s3 = sshll.u32 %s209_s2, 4  ;;  %s144_s3 = int_to_ptr.vmem [resolvable:$true] %s143_s3 }
   0x8   :  { %v104_v19 = vunpack.c.0.s8 %v103_v17  ;;  %s185_s27 = scalar_lea.vmem %s144_s3, 16  ;;  %s189_s28 = scalar_lea.vmem %s144_s3, 32 }
   0x9   :  { %p186_p0 = scmp.ne.s32.totalorder %s144_s3, %s185_s27  ;;  %p190_p1 = scmp.lt.s32.totalorder %s144_s3, %s144_s3 }
   0xa   :  { %167 = vmatpush3.bf16.msra.mxu0 %v179_v3  ;;  %v105_v21 = vcvt.s32.f32 %v104_v19  ;;  %p191_p2 = scmp.lt.s32.totalorder %s189_s28, %s185_s27 }
   0xb   :  { %168 = vmatprep.subr.bf16.mxu0 %v207_v1 }
   0xc   :  { %vm121_vm3 = vcmp.gt.f32.partialorder %v105_v21, 1.5  ;;  %vm124_vm4 = vcmp.gt.f32.partialorder %v105_v21, 0.5  ;;  %p192_p3 = por %p191_p2, %p190_p1 }
   0xe   :  { %169 = vmatpush3.bf16.msra.mxu0 %v180_v4  ;;  %p193_p4 = pnand %p192_p3, %p186_p0 }
  0x11   :  { %171 = vmatmul.mubr.msk.bf16.vlgmr.msra.gmra.mxu0 %vm59_vm1, %v19_v5 }
  0xd1   :  { %v97_v7 = vpop.f32.mrf.mxu0 }
  0xd2   :  { %v98_v8 = vadd.f32 %v151_v6, %v97_v7 }
  0xd3   :  { %v172_v9 = vpop.f32.mrf.mxu0 }
  0xd4   :  { %v107_v10 = vand.u32 2147483647, %v98_v8  ;;  %v106_v26 = vmax.f32 %v98_v8, 0.0  ;;  %v122_v29 = vsel %vm121_vm3, %v98_v8, 0.0 }
  0xd5   :  { %v100_v11 = vpop.f32.mrf.mxu0 }
  0xd6   :  { %v108_v12 = vsub.f32 0.0, %v107_v10 }
  0xd7   :  { %v173_v13 = vpop.f32.mrf.mxu0 }
  0xd8   :  { %v109_v14 = vmul.f32 1.442695, %v108_v12 }
  0xda   :  { %181 = vpow2.f32 %v109_v14 }
  0xe7   :  { %v182_v15 = vpop.eup %181 }
  0xe8   :  { %v111_v16 = vadd.f32 1.0, %v182_v15  ;;  %v114_v18 = vmul.f32 -0.5, %v182_v15  ;;  %v117_v22 = vand.u32 2147483647, %v182_v15 }
  0xea   :  { %183 = vlog2.f32 %v111_v16  ;;  %v115_v20 = vadd.f32 1.0, %v114_v18  ;;  %vm118_vm2 = vcmp.lt.f32.partialorder %v117_v22, 0.0004427343 }
  0xec   :  { %v116_v25 = vmul.f32 %v182_v15, %v115_v20 }
  0xf7   :  { %v184_v23 = vpop.eup %183 }
  0xf8   :  { %v113_v24 = vmul.f32 0.6931472, %v184_v23 }
  0xfa   :  { %v119_v27 = vsel %vm118_vm2, %v116_v25, %v113_v24 }
  0xfb   :  { %v120_v28 = vadd.f32 %v119_v27, %v106_v26 }
  0xfd   :  { %v123_v30 = vsub.f32 %v120_v28, %v122_v29 }
  0xff   :  { %v125_v31 = vsel %vm124_vm4, %v123_v30, 0.0 }
 0x100   :  { %v127_v32 = vsel %vm126_vm5, %v125_v31, 0.0 }
 0x101   :  { %v128_v33 = vrot.slane %v127_v32, 4 }
 0x103   :  { %v129_v34 = vadd.f32 %v128_v33, %v127_v32 }
 0x105   :  { %v130_v35 = vrot.slane %v129_v34, 2 }
 0x107   :  { %v131_v36 = vadd.f32 %v130_v35, %v129_v34 }
 0x109   :  { %v132_v37 = vrot.slane %v131_v36, 1 }
 0x10b   :  { %v133_v38 = vadd.f32 %v132_v37, %v131_v36 }
 0x10d   :  { %v134_v39 = vmul.f32 0.03125, %v133_v38 }
 0x10f   :  { %136 = vst.msk [vmem:[#allocation2] sm:$0x1] %vm135_vm6, %v134_v39 }
 0x110   :  { %196 = shalt.err (!%p193_p4)
}
 0x111   :  { %146 = dma.vmem_to_hbm [thread:$0]  %s144_s3, 16, %s263_s4, [#allocation3]  }
 0x112   :  { %205 = dma.done.wait [#allocation3], 16  }
 0x113   :  { %206 = vsyncadd [#allocation3], 4294967280 }
 0x114   :  { %150 = vsyncpa [#allocation3], 1 }

// kernel: tpu_custom_call.1
= control target key start
LH: loop header
LB: loop body
LE: loop exit
PB: predicated region body
PF: predicated region fallthrough
CT: control target
= control target key end

     0   :  { %v207_v1 = vmov 0.0   ;;  %vm208_vm0 = vmmov 0   ;;  %s259_s0 = inlined_call_operand.vmem [shape: bf16[2,64], index: 0, kind: input, shape index: {}]   ;;  %s260_s1 = inlined_call_operand.vmem [shape: bf16[64,16], index: 1, kind: input, shape index: {}]   ;;  %s261_s2 = inlined_call_operand.vmem [shape: f32[1,16], index: 2, kind: input, shape index: {}]   ;;  %s262_s3 = inlined_call_operand.vmem [shape: s8[2,16], index: 3, kind: input, shape index: {}]   ;;  %s263_s4 = inlined_call_operand.hbm [shape: f32[1,1,16], index: 4, kind: output, shape index: {}]  }
   0x1   :  { %v177_v0 = vld [vmem:[%s260_s1 + $0x18] sm:$0xff]   ;;  %162 = vmatprep.subr.bf16.mxu0 %v207_v1  ;;  %v178_v2 = vld [vmem:[%s260_s1 + $0x10] sm:$0xff]   ;;  %170 = vmatprep.mubr.msk.bf16.mxu0 %vm208_vm0, %v207_v1 }
   0x2   :  { %163 = vmatpush3.bf16.msra.mxu0 %v177_v0 }
   0x3   :  { %164 = vmatprep.subr.bf16.mxu0 %v207_v1 }
   0x4   :  { %9 = vsyncpa [#allocation3], 0  ;;  %v179_v3 = vld [vmem:[%s260_s1 + $0x8] sm:$0xff]   ;;  %v180_v4 = vld [vmem:[%s260_s1] sm:$0xff]   ;;  %vm59_vm1 = vcmask 523264   ;;  %vm126_vm5 = vcmask 123904  }
   0x5   :  { %v19_v5 = vld [vmem:[%s259_s0] sm:$0x1]  ;;  %vm135_vm6 = vcmask 122880  }
   0x6   :  { %165 = vmatpush3.bf16.msra.mxu0 %v178_v2  ;;  %v151_v6 = vld [vmem:[%s261_s2] ss:$0 sm:$0xff]  ;;  %s209_s2 = smov [#allocation2]  }
   0x7   :  { %166 = vmatprep.subr.bf16.mxu0 %v207_v1  ;;  %v103_v17 = vld [vmem:[%s262_s3] sm:$0x1]  ;;  %s143_s3 = sshll.u32 %s209_s2, 4  ;;  %s144_s3 = int_to_ptr.vmem [resolvable:$true] %s143_s3 }
   0x8   :  { %v104_v19 = vunpack.c.0.s8 %v103_v17  ;;  %s185_s27 = scalar_lea.vmem %s144_s3, 16  ;;  %s189_s28 = scalar_lea.vmem %s144_s3, 32 }
   0x9   :  { %p186_p0 = scmp.ne.s32.totalorder %s144_s3, %s185_s27  ;;  %p190_p1 = scmp.lt.s32.totalorder %s144_s3, %s144_s3 }
   0xa   :  { %167 = vmatpush3.bf16.msra.mxu0 %v179_v3  ;;  %v105_v21 = vcvt.s32.f32 %v104_v19  ;;  %p191_p2 = scmp.lt.s32.totalorder %s189_s28, %s185_s27 }
   0xb   :  { %168 = vmatprep.subr.bf16.mxu0 %v207_v1 }
   0xc   :  { %vm121_vm3 = vcmp.gt.f32.partialorder %v105_v21, 1.5  ;;  %vm124_vm4 = vcmp.gt.f32.partialorder %v105_v21, 0.5  ;;  %p192_p3 = por %p191_p2, %p190_p1 }
   0xe   :  { %169 = vmatpush3.bf16.msra.mxu0 %v180_v4  ;;  %p193_p4 = pnand %p192_p3, %p186_p0 }
  0x11   :  { %171 = vmatmul.mubr.msk.bf16.vlgmr.msra.gmra.mxu0 %vm59_vm1, %v19_v5 }
  0xd1   :  { %v97_v7 = vpop.f32.mrf.mxu0 }
  0xd2   :  { %v98_v8 = vadd.f32 %v151_v6, %v97_v7 }
  0xd3   :  { %v172_v9 = vpop.f32.mrf.mxu0 }
  0xd4   :  { %v107_v10 = vand.u32 2147483647, %v98_v8  ;;  %v106_v26 = vmax.f32 %v98_v8, 0.0  ;;  %v122_v29 = vsel %vm121_vm3, %v98_v8, 0.0 }
  0xd5   :  { %v100_v11 = vpop.f32.mrf.mxu0 }
  0xd6   :  { %v108_v12 = vsub.f32 0.0, %v107_v10 }
  0xd7   :  { %v173_v13 = vpop.f32.mrf.mxu0 }
  0xd8   :  { %v109_v14 = vmul.f32 1.442695, %v108_v12 }
  0xda   :  { %181 = vpow2.f32 %v109_v14 }
  0xe7   :  { %v182_v15 = vpop.eup %181 }
  0xe8   :  { %v111_v16 = vadd.f32 1.0, %v182_v15  ;;  %v114_v18 = vmul.f32 -0.5, %v182_v15  ;;  %v117_v22 = vand.u32 2147483647, %v182_v15 }
  0xea   :  { %183 = vlog2.f32 %v111_v16  ;;  %v115_v20 = vadd.f32 1.0, %v114_v18  ;;  %vm118_vm2 = vcmp.lt.f32.partialorder %v117_v22, 0.0004427343 }
  0xec   :  { %v116_v25 = vmul.f32 %v182_v15, %v115_v20 }
  0xf7   :  { %v184_v23 = vpop.eup %183 }
  0xf8   :  { %v113_v24 = vmul.f32 0.6931472, %v184_v23 }
  0xfa   :  { %v119_v27 = vsel %vm118_vm2, %v116_v25, %v113_v24 }
  0xfb   :  { %v120_v28 = vadd.f32 %v119_v27, %v106_v26 }
  0xfd   :  { %v123_v30 = vsub.f32 %v120_v28, %v122_v29 }
  0xff   :  { %v125_v31 = vsel %vm124_vm4, %v123_v30, 0.0 }
 0x100   :  { %v127_v32 = vsel %vm126_vm5, %v125_v31, 0.0 }
 0x101   :  { %v128_v33 = vrot.slane %v127_v32, 4 }
 0x103   :  { %v129_v34 = vadd.f32 %v128_v33, %v127_v32 }
 0x105   :  { %v130_v35 = vrot.slane %v129_v34, 2 }
 0x107   :  { %v131_v36 = vadd.f32 %v130_v35, %v129_v34 }
 0x109   :  { %v132_v37 = vrot.slane %v131_v36, 1 }
 0x10b   :  { %v133_v38 = vadd.f32 %v132_v37, %v131_v36 }
 0x10d   :  { %v134_v39 = vmul.f32 0.03125, %v133_v38 }
 0x10f   :  { %136 = vst.msk [vmem:[#allocation2] sm:$0x1] %vm135_vm6, %v134_v39 }
 0x110   :  { %196 = shalt.err (!%p193_p4)
}
 0x111   :  { %146 = dma.vmem_to_hbm [thread:$0]  %s144_s3, 16, %s263_s4, [#allocation3]  }
 0x112   :  { %205 = dma.done.wait [#allocation3], 16  }
 0x113   :  { %206 = vsyncadd [#allocation3], 4294967280 }
 0x114   :  { %150 = vsyncpa [#allocation3], 1 }

</bundles_post_ra>
